<compile_context>
chip_gen: v7x
topology: tpu7x:2x2x1
jax: 0.10.0
libtpu: 0.0.40
codegen_flags: <defaults>
</compile_context>

<pallas_src>
import numpy as np

import jax
import jax.numpy as jnp
from jax.experimental import pallas as pl
from jax.experimental.pallas import tpu as pltpu


def _round_up(v, m):
    return -(-v // m) * m


# ----------------------------------------------------------------------------
# Wrapper-side weight preprocessing (runs once per weight set, tiny shapes)
# ----------------------------------------------------------------------------
def _conv_as_matrix(w_oihw, hi, wi, stride, pad):
    """Lower Conv2d(bias=False) to a dense matrix acting on the NHWC-flattened
    activation vector: y_flat = a_flat @ M, with layout index (h*W + w)*C + c."""
    co, ci, kh, kw = w_oihw.shape
    ho = (hi + 2 * pad - kh) // stride + 1
    wo = (wi + 2 * pad - kw) // stride + 1

    oy, ox, ky, kx, c_i, c_o = np.meshgrid(
        np.arange(ho), np.arange(wo), np.arange(kh), np.arange(kw),
        np.arange(ci), np.arange(co), indexing="ij")
    iy = oy * stride + ky - pad
    ix = ox * stride + kx - pad
    valid = (iy >= 0) & (iy < hi) & (ix >= 0) & (ix < wi)
    iy, ix = iy[valid], ix[valid]
    rows = (iy * wi + ix) * ci + c_i[valid]
    cols = (oy[valid] * wo + ox[valid]) * co + c_o[valid]
    vals = w_oihw[c_o[valid], c_i[valid], ky[valid], kx[valid]]

    mat = jnp.zeros((hi * wi * ci, ho * wo * co), jnp.float32)
    mat = mat.at[rows, cols].set(vals)
    return mat, ho, wo


# ----------------------------------------------------------------------------
# In-kernel helper: per-channel sum, already broadcast to every lane (no MXU)
# ----------------------------------------------------------------------------
def _channel_sum_all_lanes(y, c):
    """For a (B, P*C) activation laid out position-major / channel-minor,
    return a (B, P*C) array where EVERY lane holds the sum over all P spatial
    positions of its own channel.

    Implemented as a double-and-add chain of circular lane rotations by
    multiples of C (pltpu.roll -> XLU) plus adds (VPU).  Since P*C spans the
    whole lane axis, summing all P rotations reduces each channel across
    positions while leaving the result already broadcast to every position:
    the reduce and the per-channel broadcast come from one chain, keeping the
    InstanceNorm statistics entirely off the MXU.  Works for any P."""
    width = y.shape[-1]
    p = width // c
    acc = y          # invariant: acc = sum of the first m rotations of y
    m = 1
    for bit in range(p.bit_length() - 2, -1, -1):
        acc = acc + pltpu.roll(acc, shift=m * c, axis=1)   # -> first 2m rotations
        m *= 2
        if (p >> bit) & 1:
            acc = acc + pltpu.roll(y, shift=m * c, axis=1)  # -> first m+1 rotations
            m += 1
    return acc


# ----------------------------------------------------------------------------
# Fused Pallas kernel: conv1 + IN + LReLU -> conv2 + IN + LReLU -> final conv
# ----------------------------------------------------------------------------
def _make_fused_kernel(num_hidden, chans, slope, eps):
    def kernel(*refs):
        x_ref = refs[0]
        conv_refs = refs[1:2 + num_hidden]      # num_hidden + 1 conv matrices
        o_ref = refs[-1]

        a = x_ref[...]                          # (B, Hi*Wi*Ci) bf16
        for l in range(num_hidden):
            # Conv as one MXU matmul (batch folded into M): bf16 in, f32 acc.
            y = jnp.dot(a, conv_refs[l][...], preferred_element_type=jnp.float32)
            c = chans[l]
            p = y.shape[-1] // c
            # InstanceNorm per (sample, channel), one-pass stats, all f32,
            # computed on XLU/VPU (no MXU stats matmuls, no constants).
            mu_b = _channel_sum_all_lanes(y, c) * (1.0 / p)          # E[y]
            ms_b = _channel_sum_all_lanes(y * y, c) * (1.0 / p)      # E[y^2]
            var_b = jnp.maximum(ms_b - mu_b * mu_b, 0.0)
            yn = (y - mu_b) * jax.lax.rsqrt(var_b + eps)
            # LeakyReLU(0.2) in f32, then cast to bf16 only for the next MXU op.
            a = jnp.where(yn >= 0.0, yn, slope * yn).astype(jnp.bfloat16)

        # Final 4x4 stride-1 conv (1x1 spatial output) as an epilogue matmul;
        # output columns are pre-padded to >=128 lanes (unmasked stores).
        o_ref[...] = jnp.dot(a, conv_refs[num_hidden][...],
                             preferred_element_type=jnp.float32).astype(o_ref.dtype)
    return kernel


# ----------------------------------------------------------------------------
# DCEncoder: parameter construction + forward
# ----------------------------------------------------------------------------
def init_dcencoder_params(key, isize, nz, ndf):
    assert isize % 16 == 0, "isize has to be a multiple of 16"
    shapes = [(ndf, 1, 4, 4)]
    csize, cndf = isize // 2, ndf
    while csize > 4:
        shapes.append((cndf * 2, cndf, 4, 4))
        cndf *= 2
        csize //= 2
    shapes.append((nz, cndf, 4, 4))          # add_final_conv=True
    keys = jax.random.split(key, len(shapes))
    # deterministic DCGAN-style init: N(0, 0.02)
    return [0.02 * jax.random.normal(k, s, jnp.float32) for k, s in zip(keys, shapes)]


def dcencoder_forward(params, x_nchw, *, slope=0.2, eps=1e-5):
    n, cin, hi, wi = x_nchw.shape
    num_hidden = len(params) - 1
    nz = int(params[-1].shape[0])
    chans = [int(w.shape[0]) for w in params[:-1]]
    in_dim = hi * wi * cin

    # NCHW -> flattened NHWC per sample (position-major, channel-minor).
    x2d = jnp.transpose(x_nchw, (0, 2, 3, 1)).reshape(n, in_dim)

    # Per-layer conv matrices; bf16 (MXU-native), f32 accumulation in-kernel.
    conv_mats = []
    h, w = hi, wi
    for idx, wgt in enumerate(params):
        stride, pad = (2, 1) if idx < num_hidden else (1, 0)
        m, h, w = _conv_as_matrix(wgt, h, w, stride, pad)
        conv_mats.append(m)
    # Lane-dense output: pad the final conv's nz output columns to >=128 zero
    # columns so the kernel's writeback is full unmasked vector stores.
    out_lanes = max(128, _round_up(nz, 128))
    conv_mats[-1] = jnp.pad(conv_mats[-1], ((0, 0), (0, out_lanes - nz)))
    conv_mats = [m.astype(jnp.bfloat16) for m in conv_mats]

    # Batch blocking: big blocks amortize the ~0.35us per-grid-step overhead
    # and fill the MXU rows (128 = v5e array height, 256 = v6e/v7x); >=2 grid
    # steps once the batch is large enough so dimension_semantics=("parallel",)
    # can shard across v7x's two TensorCores.  Small batches = one block.
    n8 = _round_up(n, 8)
    if n8 < 256:
        blk = n8
    else:
        blk = 128 if n8 < 512 else 256
    n_pad = _round_up(n8, blk)
    if n_pad != n:
        x2d = jnp.pad(x2d, ((0, n_pad - n), (0, 0)))   # zero rows are benign
    x2d = x2d.astype(jnp.bfloat16)

    flops = int(2 * n_pad * sum(int(m.shape[0]) * int(m.shape[1]) for m in conv_mats))
    transcend = int(n_pad * sum(int(conv_mats[l].shape[1]) for l in range(num_hidden)))
    bytes_accessed = int(n_pad * in_dim * 2 + n_pad * out_lanes * 4
                         + sum(int(m.shape[0]) * int(m.shape[1]) * 2 for m in conv_mats))

    kernel = _make_fused_kernel(num_hidden, chans, slope, eps)

    z2d = pl.pallas_call(
        kernel,
        out_shape=jax.ShapeDtypeStruct((n_pad, out_lanes), jnp.float32),
        grid=(n_pad // blk,),
        in_specs=[pl.BlockSpec((blk, in_dim), lambda i: (i, 0))]
                # Constants: block index never changes -> single-buffered so the
                # pipeline does not hold a redundant second VMEM copy.
                + [pl.BlockSpec(m.shape, lambda i: (0, 0),
                                pipeline_mode=pl.Buffered(1))
                   for m in conv_mats],
        out_specs=pl.BlockSpec((blk, out_lanes), lambda i: (i, 0)),
        compiler_params=pltpu.CompilerParams(
            dimension_semantics=("parallel",),
            vmem_limit_bytes=32 * 1024 * 1024),
        cost_estimate=pl.CostEstimate(flops=flops,
                                      transcendentals=transcend,
                                      bytes_accessed=bytes_accessed),
    )(x2d, *conv_mats)

    # (N, nz) -> (N, nz, 1, 1) like PyTorch (final conv has 1x1 spatial output).
    return z2d[:n, :nz].reshape(n, nz, 1, 1)


# ----------------------------------------------------------------------------
# Pure-JAX f32 reference of the PyTorch module (for a tolerance check only)
# ----------------------------------------------------------------------------
def _reference_forward(params, x, slope=0.2, eps=1e-5):
    num_hidden = len(params) - 1
    a = x
    for i, w in enumerate(params):
        stride, pad = (2, 1) if i < num_hidden else (1, 0)
        a = jax.lax.conv_general_dilated(
            a, w, window_strides=(stride, stride),
            padding=[(pad, pad), (pad, pad)],
            dimension_numbers=("NCHW", "OIHW", "NCHW"))
        if i < num_hidden:
            mu = jnp.mean(a, axis=(2, 3), keepdims=True)
            var = jnp.var(a, axis=(2, 3), keepdims=True)       # biased, like torch IN
            a = (a - mu) * jax.lax.rsqrt(var + eps)
            a = jnp.where(a >= 0.0, a, slope * a)
    return a


if __name__ == "__main__":
    isize, nz, ndf = 16, 16, 8
    key = jax.random.PRNGKey(0)
    k_x, k_p = jax.random.split(key)

    x = jax.random.normal(k_x, (2, 1, isize, isize), jnp.float32)
    params = init_dcencoder_params(k_p, isize, nz, ndf)

    z = jax.jit(dcencoder_forward)(params, x)
    jax.block_until_ready(z)
    assert z.shape == (2, nz, 1, 1), z.shape

    # Tolerance check vs the f32 reference (kernel uses bf16 MXU inputs).
    z_ref = _reference_forward(params, x)
    err = float(jnp.max(jnp.abs(z - z_ref)))
    ref_scale = float(jnp.max(jnp.abs(z_ref)))
    assert err <= 0.1 * max(1.0, ref_scale), f"mismatch: {err} vs scale {ref_scale}"

    print("KERNEL_OK")
</pallas_src>

<mosaic_0001>
module attributes {stable_mosaic.version = 11 : i64} {
  func.func private @main(%arg0: i32) attributes {dimension_semantics = [#tpu.dimension_semantics<core_parallel>], iteration_bounds = array<i64: 2>, tpu.core_type = #tpu.core_type<sc_scalar_subcore>, window_params = []} {
    return
  }
}

module attributes {stable_mosaic.version = 11 : i64} {
  func.func private @main(%arg0: i32) attributes {dimension_semantics = [#tpu.dimension_semantics<core_parallel>], iteration_bounds = array<i64: 2>, tpu.core_type = #tpu.core_type<sc_scalar_subcore>, window_params = []} {
    return
  }
}

module attributes {stable_mosaic.version = 11 : i64} {
  func.func @kernel(%arg0: i32, %arg1: memref<8x256xbf16, #tpu.memory_space<vmem>>, %arg2: memref<256x512xbf16, #tpu.memory_space<vmem>>, %arg3: memref<512x256xbf16, #tpu.memory_space<vmem>>, %arg4: memref<256x128xbf16, #tpu.memory_space<vmem>>, %arg5: memref<8x128xf32, #tpu.memory_space<vmem>>) attributes {dimension_semantics = [#tpu.dimension_semantics<parallel>], iteration_bounds = array<i64: 1>, scalar_prefetch = 0 : i64, scratch_operands = 0 : i64, tpu.core_type = #tpu.core_type<tc>, window_params = [{transform_indices = @transform_0, window_bounds = array<i64: 8, 256>}, {pipeline_mode = #tpu.pipeline_mode<synchronous>, transform_indices = @transform_1, window_bounds = array<i64: 256, 512>}, {pipeline_mode = #tpu.pipeline_mode<synchronous>, transform_indices = @transform_2, window_bounds = array<i64: 512, 256>}, {pipeline_mode = #tpu.pipeline_mode<synchronous>, transform_indices = @transform_3, window_bounds = array<i64: 256, 128>}, {transform_indices = @transform_4, window_bounds = array<i64: 8, 128>}]} {
    %c0 = arith.constant 0 : index
    %c0_0 = arith.constant 0 : index
    %0 = vector.load %arg1[%c0, %c0_0] : memref<8x256xbf16, #tpu.memory_space<vmem>>, vector<8x256xbf16>
    %c0_1 = arith.constant 0 : index
    %c0_2 = arith.constant 0 : index
    %1 = vector.load %arg2[%c0_1, %c0_2] : memref<256x512xbf16, #tpu.memory_space<vmem>>, vector<256x512xbf16>
    %cst = arith.constant dense<0.000000e+00> : vector<8x512xf32>
    %2 = tpu.matmul %0, %1, %cst {dimension_numbers = #tpu.dot_dimension_numbers<[1], [0], [0], [1], [0, 0, 1, 1], [], []>} : vector<8x256xbf16>, vector<256x512xbf16>, vector<8x512xf32> -> vector<8x512xf32>
    %c8_i32 = arith.constant 8 : i32
    %3 = tpu.dynamic_rotate %2 by %c8_i32 dim 1 : vector<8x512xf32>, i32 -> vector<8x512xf32>
    %4 = arith.addf %2, %3 : vector<8x512xf32>
    %c16_i32 = arith.constant 16 : i32
    %5 = tpu.dynamic_rotate %4 by %c16_i32 dim 1 : vector<8x512xf32>, i32 -> vector<8x512xf32>
    %6 = arith.addf %4, %5 : vector<8x512xf32>
    %c32_i32 = arith.constant 32 : i32
    %7 = tpu.dynamic_rotate %6 by %c32_i32 dim 1 : vector<8x512xf32>, i32 -> vector<8x512xf32>
    %8 = arith.addf %6, %7 : vector<8x512xf32>
    %c64_i32 = arith.constant 64 : i32
    %9 = tpu.dynamic_rotate %8 by %c64_i32 dim 1 : vector<8x512xf32>, i32 -> vector<8x512xf32>
    %10 = arith.addf %8, %9 : vector<8x512xf32>
    %c128_i32 = arith.constant 128 : i32
    %11 = tpu.dynamic_rotate %10 by %c128_i32 dim 1 : vector<8x512xf32>, i32 -> vector<8x512xf32>
    %12 = arith.addf %10, %11 : vector<8x512xf32>
    %c256_i32 = arith.constant 256 : i32
    %13 = tpu.dynamic_rotate %12 by %c256_i32 dim 1 : vector<8x512xf32>, i32 -> vector<8x512xf32>
    %14 = arith.addf %12, %13 : vector<8x512xf32>
    %cst_3 = arith.constant 1.562500e-02 : f32
    %15 = vector.broadcast %cst_3 : f32 to vector<8x512xf32>
    %16 = arith.mulf %14, %15 : vector<8x512xf32>
    %17 = arith.mulf %2, %2 : vector<8x512xf32>
    %c8_i32_4 = arith.constant 8 : i32
    %18 = tpu.dynamic_rotate %17 by %c8_i32_4 dim 1 : vector<8x512xf32>, i32 -> vector<8x512xf32>
    %19 = arith.addf %17, %18 : vector<8x512xf32>
    %c16_i32_5 = arith.constant 16 : i32
    %20 = tpu.dynamic_rotate %19 by %c16_i32_5 dim 1 : vector<8x512xf32>, i32 -> vector<8x512xf32>
    %21 = arith.addf %19, %20 : vector<8x512xf32>
    %c32_i32_6 = arith.constant 32 : i32
    %22 = tpu.dynamic_rotate %21 by %c32_i32_6 dim 1 : vector<8x512xf32>, i32 -> vector<8x512xf32>
    %23 = arith.addf %21, %22 : vector<8x512xf32>
    %c64_i32_7 = arith.constant 64 : i32
    %24 = tpu.dynamic_rotate %23 by %c64_i32_7 dim 1 : vector<8x512xf32>, i32 -> vector<8x512xf32>
    %25 = arith.addf %23, %24 : vector<8x512xf32>
    %c128_i32_8 = arith.constant 128 : i32
    %26 = tpu.dynamic_rotate %25 by %c128_i32_8 dim 1 : vector<8x512xf32>, i32 -> vector<8x512xf32>
    %27 = arith.addf %25, %26 : vector<8x512xf32>
    %c256_i32_9 = arith.constant 256 : i32
    %28 = tpu.dynamic_rotate %27 by %c256_i32_9 dim 1 : vector<8x512xf32>, i32 -> vector<8x512xf32>
    %29 = arith.addf %27, %28 : vector<8x512xf32>
    %cst_10 = arith.constant 1.562500e-02 : f32
    %30 = vector.broadcast %cst_10 : f32 to vector<8x512xf32>
    %31 = arith.mulf %29, %30 : vector<8x512xf32>
    %32 = arith.mulf %16, %16 : vector<8x512xf32>
    %33 = arith.subf %31, %32 : vector<8x512xf32>
    %cst_11 = arith.constant 0.000000e+00 : f32
    %34 = vector.broadcast %cst_11 : f32 to vector<8x512xf32>
    %35 = arith.maximumf %33, %34 : vector<8x512xf32>
    %36 = arith.subf %2, %16 : vector<8x512xf32>
    %cst_12 = arith.constant 9.99999974E-6 : f32
    %37 = vector.broadcast %cst_12 : f32 to vector<8x512xf32>
    %38 = arith.addf %35, %37 : vector<8x512xf32>
    %39 = math.rsqrt %38 : vector<8x512xf32>
    %40 = arith.mulf %36, %39 : vector<8x512xf32>
    %cst_13 = arith.constant 0.000000e+00 : f32
    %41 = vector.broadcast %cst_13 : f32 to vector<8x512xf32>
    %42 = arith.cmpf oge, %40, %41 : vector<8x512xf32>
    %cst_14 = arith.constant 2.000000e-01 : f32
    %43 = vector.broadcast %cst_14 : f32 to vector<8x512xf32>
    %44 = arith.mulf %43, %40 : vector<8x512xf32>
    %45 = arith.select %42, %40, %44 : vector<8x512xi1>, vector<8x512xf32>
    %46 = arith.truncf %45 : vector<8x512xf32> to vector<8x512xbf16>
    %c0_15 = arith.constant 0 : index
    %c0_16 = arith.constant 0 : index
    %47 = vector.load %arg3[%c0_15, %c0_16] : memref<512x256xbf16, #tpu.memory_space<vmem>>, vector<512x256xbf16>
    %cst_17 = arith.constant dense<0.000000e+00> : vector<8x256xf32>
    %48 = tpu.matmul %46, %47, %cst_17 {dimension_numbers = #tpu.dot_dimension_numbers<[1], [0], [0], [1], [0, 0, 1, 1], [], []>} : vector<8x512xbf16>, vector<512x256xbf16>, vector<8x256xf32> -> vector<8x256xf32>
    %c16_i32_18 = arith.constant 16 : i32
    %49 = tpu.dynamic_rotate %48 by %c16_i32_18 dim 1 : vector<8x256xf32>, i32 -> vector<8x256xf32>
    %50 = arith.addf %48, %49 : vector<8x256xf32>
    %c32_i32_19 = arith.constant 32 : i32
    %51 = tpu.dynamic_rotate %50 by %c32_i32_19 dim 1 : vector<8x256xf32>, i32 -> vector<8x256xf32>
    %52 = arith.addf %50, %51 : vector<8x256xf32>
    %c64_i32_20 = arith.constant 64 : i32
    %53 = tpu.dynamic_rotate %52 by %c64_i32_20 dim 1 : vector<8x256xf32>, i32 -> vector<8x256xf32>
    %54 = arith.addf %52, %53 : vector<8x256xf32>
    %c128_i32_21 = arith.constant 128 : i32
    %55 = tpu.dynamic_rotate %54 by %c128_i32_21 dim 1 : vector<8x256xf32>, i32 -> vector<8x256xf32>
    %56 = arith.addf %54, %55 : vector<8x256xf32>
    %cst_22 = arith.constant 6.250000e-02 : f32
    %57 = vector.broadcast %cst_22 : f32 to vector<8x256xf32>
    %58 = arith.mulf %56, %57 : vector<8x256xf32>
    %59 = arith.mulf %48, %48 : vector<8x256xf32>
    %c16_i32_23 = arith.constant 16 : i32
    %60 = tpu.dynamic_rotate %59 by %c16_i32_23 dim 1 : vector<8x256xf32>, i32 -> vector<8x256xf32>
    %61 = arith.addf %59, %60 : vector<8x256xf32>
    %c32_i32_24 = arith.constant 32 : i32
    %62 = tpu.dynamic_rotate %61 by %c32_i32_24 dim 1 : vector<8x256xf32>, i32 -> vector<8x256xf32>
    %63 = arith.addf %61, %62 : vector<8x256xf32>
    %c64_i32_25 = arith.constant 64 : i32
    %64 = tpu.dynamic_rotate %63 by %c64_i32_25 dim 1 : vector<8x256xf32>, i32 -> vector<8x256xf32>
    %65 = arith.addf %63, %64 : vector<8x256xf32>
    %c128_i32_26 = arith.constant 128 : i32
    %66 = tpu.dynamic_rotate %65 by %c128_i32_26 dim 1 : vector<8x256xf32>, i32 -> vector<8x256xf32>
    %67 = arith.addf %65, %66 : vector<8x256xf32>
    %cst_27 = arith.constant 6.250000e-02 : f32
    %68 = vector.broadcast %cst_27 : f32 to vector<8x256xf32>
    %69 = arith.mulf %67, %68 : vector<8x256xf32>
    %70 = arith.mulf %58, %58 : vector<8x256xf32>
    %71 = arith.subf %69, %70 : vector<8x256xf32>
    %cst_28 = arith.constant 0.000000e+00 : f32
    %72 = vector.broadcast %cst_28 : f32 to vector<8x256xf32>
    %73 = arith.maximumf %71, %72 : vector<8x256xf32>
    %74 = arith.subf %48, %58 : vector<8x256xf32>
    %cst_29 = arith.constant 9.99999974E-6 : f32
    %75 = vector.broadcast %cst_29 : f32 to vector<8x256xf32>
    %76 = arith.addf %73, %75 : vector<8x256xf32>
    %77 = math.rsqrt %76 : vector<8x256xf32>
    %78 = arith.mulf %74, %77 : vector<8x256xf32>
    %cst_30 = arith.constant 0.000000e+00 : f32
    %79 = vector.broadcast %cst_30 : f32 to vector<8x256xf32>
    %80 = arith.cmpf oge, %78, %79 : vector<8x256xf32>
    %cst_31 = arith.constant 2.000000e-01 : f32
    %81 = vector.broadcast %cst_31 : f32 to vector<8x256xf32>
    %82 = arith.mulf %81, %78 : vector<8x256xf32>
    %83 = arith.select %80, %78, %82 : vector<8x256xi1>, vector<8x256xf32>
    %84 = arith.truncf %83 : vector<8x256xf32> to vector<8x256xbf16>
    %c0_32 = arith.constant 0 : index
    %c0_33 = arith.constant 0 : index
    %85 = vector.load %arg4[%c0_32, %c0_33] : memref<256x128xbf16, #tpu.memory_space<vmem>>, vector<256x128xbf16>
    %cst_34 = arith.constant dense<0.000000e+00> : vector<8x128xf32>
    %86 = tpu.matmul %84, %85, %cst_34 {dimension_numbers = #tpu.dot_dimension_numbers<[1], [0], [0], [1], [0, 0, 1, 1], [], []>} : vector<8x256xbf16>, vector<256x128xbf16>, vector<8x128xf32> -> vector<8x128xf32>
    %c0_35 = arith.constant 0 : index
    %c0_36 = arith.constant 0 : index
    %87 = vector.load %arg5[%c0_35, %c0_36] : memref<8x128xf32, #tpu.memory_space<vmem>>, vector<8x128xf32>
    tpu.vector_store %arg5[%c0_35, %c0_36], %86 {strides = array<i32>} : memref<8x128xf32, #tpu.memory_space<vmem>>, vector<8x128xf32>,
    return
  }
  func.func @transform_0(%arg0: i32) -> (i32, i32) {
    %c0_i32 = arith.constant 0 : i32
    %c0_i32_0 = arith.constant 0 : i32
    return %arg0, %c0_i32 : i32, i32
  }
  func.func @transform_1(%arg0: i32) -> (i32, i32) {
    %c0_i32 = arith.constant 0 : i32
    %c0_i32_0 = arith.constant 0 : i32
    %c0_i32_1 = arith.constant 0 : i32
    return %c0_i32, %c0_i32_0 : i32, i32
  }
  func.func @transform_2(%arg0: i32) -> (i32, i32) {
    %c0_i32 = arith.constant 0 : i32
    %c0_i32_0 = arith.constant 0 : i32
    %c0_i32_1 = arith.constant 0 : i32
    return %c0_i32, %c0_i32_0 : i32, i32
  }
  func.func @transform_3(%arg0: i32) -> (i32, i32) {
    %c0_i32 = arith.constant 0 : i32
    %c0_i32_0 = arith.constant 0 : i32
    %c0_i32_1 = arith.constant 0 : i32
    return %c0_i32, %c0_i32_0 : i32, i32
  }
  func.func @transform_4(%arg0: i32) -> (i32, i32) {
    %c0_i32 = arith.constant 0 : i32
    %c0_i32_0 = arith.constant 0 : i32
    return %arg0, %c0_i32 : i32, i32
  }
}

</mosaic_0001>

<bundles_post_ra>
// kernel: dcencoder_forward.1
= control target key start
LH: loop header
LB: loop body
LE: loop exit
PB: predicated region body
PF: predicated region fallthrough
CT: control target
= control target key end

     0   :  { %s1782_s11 = smov 8   ;;  %s1784_s12 = smov 32   ;;  %s2474_s1 = inlined_call_operand.vmem [shape: bf16[256,512], index: 1, kind: input, shape index: {}]   ;;  %s2475_s0 = inlined_call_operand.vmem [shape: bf16[8,256], index: 0, kind: input, shape index: {}]   ;;  %s2476_s2 = inlined_call_operand.vmem [shape: bf16[512,256], index: 2, kind: input, shape index: {}]   ;;  %s2477_s3 = inlined_call_operand.vmem [shape: bf16[256,128], index: 3, kind: input, shape index: {}]   ;;  %s2478_s4 = inlined_call_operand.vmem [shape: f32[8,128], index: 4, kind: output, shape index: {}]  }
   0x1   :  { %v1566_v0 = vld [vmem:[%s2474_s1 + $0x4] ss:$16 sps:$4 sm:$0xff]   ;;  %v1568_v1 = vld [vmem:[%s2474_s1] ss:$16 sps:$4 sm:$0xff]   ;;  %v1618_v34 = vld [vmem:[%s2474_s1 + $0xc] ss:$16 sps:$4 sm:$0xff]  }
   0x2   :  { %410 = vmatprep.subr.bf16.mxu1 %v1566_v0  ;;  %v1569_v2 = vld [vmem:[%s2474_s1 + $0x24] ss:$16 sps:$4 sm:$0xff]   ;;  %v1571_v3 = vld [vmem:[%s2474_s1 + $0x20] ss:$16 sps:$4 sm:$0xff]   ;;  %v1616_v36 = vld [vmem:[%s2474_s1 + $0x8] ss:$16 sps:$4 sm:$0xff]  }
   0x3   :  { %411 = vmatpush1.bf16.msra.mxu1 %v1568_v1  ;;  %v1572_v4 = vld [vmem:[%s2474_s1 + $0x44] ss:$16 sps:$4 sm:$0xff]   ;;  %v1574_v5 = vld [vmem:[%s2474_s1 + $0x40] ss:$16 sps:$4 sm:$0xff]   ;;  %v1621_v37 = vld [vmem:[%s2474_s1 + $0x2c] ss:$16 sps:$4 sm:$0xff]  }
   0x4   :  { %412 = vmatprep.subr.bf16.mxu1 %v1569_v2  ;;  %v1575_v6 = vld [vmem:[%s2474_s1 + $0x64] ss:$16 sps:$4 sm:$0xff]   ;;  %v1577_v7 = vld [vmem:[%s2474_s1 + $0x60] ss:$16 sps:$4 sm:$0xff]   ;;  %v1619_v38 = vld [vmem:[%s2474_s1 + $0x28] ss:$16 sps:$4 sm:$0xff]  }
   0x5   :  { %v1578_v8 = vld [vmem:[%s2474_s1 + $0x84] ss:$16 sps:$4 sm:$0xff]   ;;  %v1580_v9 = vld [vmem:[%s2474_s1 + $0x80] ss:$16 sps:$4 sm:$0xff]   ;;  %v1624_v39 = vld [vmem:[%s2474_s1 + $0x4c] ss:$16 sps:$4 sm:$0xff]  }
   0x6   :  { %v1581_v10 = vld [vmem:[%s2474_s1 + $0xa4] ss:$16 sps:$4 sm:$0xff]   ;;  %v1583_v11 = vld [vmem:[%s2474_s1 + $0xa0] ss:$16 sps:$4 sm:$0xff]   ;;  %v1622_v40 = vld [vmem:[%s2474_s1 + $0x48] ss:$16 sps:$4 sm:$0xff]  }
   0x7   :  { %413 = vmatpush1.bf16.msra.mxu1 %v1571_v3  ;;  %v1584_v12 = vld [vmem:[%s2474_s1 + $0xc4] ss:$16 sps:$4 sm:$0xff]   ;;  %v1586_v15 = vld [vmem:[%s2474_s1 + $0xc0] ss:$16 sps:$4 sm:$0xff]   ;;  %v1627_v41 = vld [vmem:[%s2474_s1 + $0x6c] ss:$16 sps:$4 sm:$0xff]  }
   0x8   :  { %414 = vmatprep.subr.bf16.mxu1 %v1572_v4  ;;  %v18_v13 = vld [vmem:[%s2475_s0] sm:$0xff]  ;;  %v1625_v42 = vld [vmem:[%s2474_s1 + $0x68] ss:$16 sps:$4 sm:$0xff]   ;;  %v1630_v43 = vld [vmem:[%s2474_s1 + $0x8c] ss:$16 sps:$4 sm:$0xff]   ;;  %s1785_s19 = smov 64  }
   0x9   :  { %v1391_v14 = vcombine.high %v18_v13, %v18_v13  ;;  %v1587_v16 = vld [vmem:[%s2474_s1 + $0xe4] ss:$16 sps:$4 sm:$0xff]   ;;  %v1589_v17 = vld [vmem:[%s2474_s1 + $0xe0] ss:$16 sps:$4 sm:$0xff]   ;;  %v1913_v35 = vcombine.low %v18_v13, %v18_v13  ;;  %v1628_v44 = vld [vmem:[%s2474_s1 + $0x88] ss:$16 sps:$4 sm:$0xff]  }
   0xa   :  { %v1590_v18 = vld [vmem:[%s2474_s1 + $0x104] ss:$16 sps:$4 sm:$0xff]   ;;  %v1592_v19 = vld [vmem:[%s2474_s1 + $0x100] ss:$16 sps:$4 sm:$0xff]   ;;  %v1633_v45 = vld [vmem:[%s2474_s1 + $0xac] ss:$16 sps:$4 sm:$0xff]  }
   0xb   :  { %415 = vmatpush1.bf16.msra.mxu1 %v1574_v5  ;;  %442 = vmatprep.mubr.bf16.mxu1 %v1391_v14  ;;  %v1593_v20 = vld [vmem:[%s2474_s1 + $0x124] ss:$16 sps:$4 sm:$0xff]   ;;  %v1595_v21 = vld [vmem:[%s2474_s1 + $0x120] ss:$16 sps:$4 sm:$0xff]   ;;  %v1631_v46 = vld [vmem:[%s2474_s1 + $0xa8] ss:$16 sps:$4 sm:$0xff]  }
   0xc   :  { %416 = vmatprep.subr.bf16.mxu1 %v1575_v6  ;;  %v1596_v22 = vld [vmem:[%s2474_s1 + $0x144] ss:$16 sps:$4 sm:$0xff]   ;;  %v1598_v23 = vld [vmem:[%s2474_s1 + $0x140] ss:$16 sps:$4 sm:$0xff]   ;;  %v1636_v47 = vld [vmem:[%s2474_s1 + $0xcc] ss:$16 sps:$4 sm:$0xff]  }
   0xd   :  { %v1599_v24 = vld [vmem:[%s2474_s1 + $0x164] ss:$16 sps:$4 sm:$0xff]   ;;  %v1601_v25 = vld [vmem:[%s2474_s1 + $0x160] ss:$16 sps:$4 sm:$0xff]   ;;  %v1634_v48 = vld [vmem:[%s2474_s1 + $0xc8] ss:$16 sps:$4 sm:$0xff]  }
   0xe   :  { %v1602_v26 = vld [vmem:[%s2474_s1 + $0x184] ss:$16 sps:$4 sm:$0xff]   ;;  %v1604_v27 = vld [vmem:[%s2474_s1 + $0x180] ss:$16 sps:$4 sm:$0xff]   ;;  %v1639_v49 = vld [vmem:[%s2474_s1 + $0xec] ss:$16 sps:$4 sm:$0xff]  }
   0xf   :  { %417 = vmatpush1.bf16.msra.mxu1 %v1577_v7  ;;  %v1605_v28 = vld [vmem:[%s2474_s1 + $0x1a4] ss:$16 sps:$4 sm:$0xff]   ;;  %v1607_v29 = vld [vmem:[%s2474_s1 + $0x1a0] ss:$16 sps:$4 sm:$0xff]   ;;  %v1637_v50 = vld [vmem:[%s2474_s1 + $0xe8] ss:$16 sps:$4 sm:$0xff]  }
  0x10   :  { %418 = vmatprep.subr.bf16.mxu1 %v1578_v8  ;;  %v1608_v30 = vld [vmem:[%s2474_s1 + $0x1c4] ss:$16 sps:$4 sm:$0xff]   ;;  %v1610_v31 = vld [vmem:[%s2474_s1 + $0x1c0] ss:$16 sps:$4 sm:$0xff]   ;;  %v1642_v51 = vld [vmem:[%s2474_s1 + $0x10c] ss:$16 sps:$4 sm:$0xff]  }
  0x11   :  { %v1611_v32 = vld [vmem:[%s2474_s1 + $0x1e4] ss:$16 sps:$4 sm:$0xff]   ;;  %v1613_v33 = vld [vmem:[%s2474_s1 + $0x1e0] ss:$16 sps:$4 sm:$0xff]   ;;  %v1640_v52 = vld [vmem:[%s2474_s1 + $0x108] ss:$16 sps:$4 sm:$0xff]  }
  0x12   :  { %v1645_v53 = vld [vmem:[%s2474_s1 + $0x12c] ss:$16 sps:$4 sm:$0xff]   ;;  %v1643_v54 = vld [vmem:[%s2474_s1 + $0x128] ss:$16 sps:$4 sm:$0xff]  }
  0x13   :  { %419 = vmatpush1.bf16.msra.mxu1 %v1580_v9  ;;  %v1648_v55 = vld [vmem:[%s2474_s1 + $0x14c] ss:$16 sps:$4 sm:$0xff]   ;;  %v1646_v56 = vld [vmem:[%s2474_s1 + $0x148] ss:$16 sps:$4 sm:$0xff]  }
  0x14   :  { %420 = vmatprep.subr.bf16.mxu1 %v1581_v10  ;;  %v1651_v57 = vld [vmem:[%s2474_s1 + $0x16c] ss:$16 sps:$4 sm:$0xff]   ;;  %v1649_v58 = vld [vmem:[%s2474_s1 + $0x168] ss:$16 sps:$4 sm:$0xff]  }
  0x15   :  { %v1654_v59 = vld [vmem:[%s2474_s1 + $0x18c] ss:$16 sps:$4 sm:$0xff]   ;;  %v1652_v60 = vld [vmem:[%s2474_s1 + $0x188] ss:$16 sps:$4 sm:$0xff]  }
  0x16   :  { %v1657_v61 = vld [vmem:[%s2474_s1 + $0x1ac] ss:$16 sps:$4 sm:$0xff]   ;;  %v1655_v62 = vld [vmem:[%s2474_s1 + $0x1a8] ss:$16 sps:$4 sm:$0xff]  }
  0x17   :  { %421 = vmatpush1.bf16.msra.mxu1 %v1583_v11  ;;  %v1660_v63 = vld [vmem:[%s2474_s1 + $0x1cc] ss:$16 sps:$4 sm:$0xff]   ;;  %v1658_v0 = vld [vmem:[%s2474_s1 + $0x1c8] ss:$16 sps:$4 sm:$0xff]  }
  0x18   :  { %422 = vmatprep.subr.bf16.mxu1 %v1584_v12  ;;  %v1663_v1 = vld [vmem:[%s2474_s1 + $0x1ec] ss:$16 sps:$4 sm:$0xff]   ;;  %v1661_v2 = vld [vmem:[%s2474_s1 + $0x1e8] ss:$16 sps:$4 sm:$0xff]   ;;  %s1783_s1 = smov 16  }
  0x1b   :  { %423 = vmatpush1.bf16.msra.mxu1 %v1586_v15  ;;  %v500_v15 = vlaneseq }
  0x1c   :  { %424 = vmatprep.subr.bf16.mxu1 %v1587_v16 }
  0x1d   :  { %v2030_v16 = vand.u32 127, %v500_v15  ;;  %v1679_v15 = vld [vmem:[%s2476_s2 + $0x54] ss:$8 sps:$4 sm:$0xff]  }
  0x1f   :  { %425 = vmatpush1.bf16.msra.mxu1 %v1589_v17  ;;  %vm502_vm0 = vcmp.lt.s32.totalorder %v2030_v16, 8  ;;  %vm519_vm1 = vcmp.lt.s32.totalorder %v2030_v16, 16  ;;  %vm536_vm2 = vcmp.lt.s32.totalorder %v2030_v16, 32  ;;  %vm553_vm3 = vcmp.lt.s32.totalorder %v2030_v16, 64 }
  0x20   :  { %426 = vmatprep.subr.bf16.mxu1 %v1590_v18 }
  0x23   :  { %427 = vmatpush1.bf16.msra.mxu1 %v1592_v19 }
  0x24   :  { %428 = vmatprep.subr.bf16.mxu1 %v1593_v20 }
  0x27   :  { %429 = vmatpush1.bf16.msra.mxu1 %v1595_v21 }
  0x28   :  { %430 = vmatprep.subr.bf16.mxu1 %v1596_v22 }
  0x2b   :  { %431 = vmatpush1.bf16.msra.mxu1 %v1598_v23 }
  0x2c   :  { %432 = vmatprep.subr.bf16.mxu1 %v1599_v24 }
  0x2f   :  { %433 = vmatpush1.bf16.msra.mxu1 %v1601_v25 }
  0x30   :  { %434 = vmatprep.subr.bf16.mxu1 %v1602_v26 }
  0x33   :  { %435 = vmatpush1.bf16.msra.mxu1 %v1604_v27 }
  0x34   :  { %436 = vmatprep.subr.bf16.mxu1 %v1605_v28 }
  0x37   :  { %437 = vmatpush1.bf16.msra.mxu1 %v1607_v29 }
  0x38   :  { %438 = vmatprep.subr.bf16.mxu1 %v1608_v30 }
  0x3b   :  { %439 = vmatpush1.bf16.msra.mxu1 %v1610_v31 }
  0x3c   :  { %440 = vmatprep.subr.bf16.mxu1 %v1611_v32 }
  0x3f   :  { %441 = vmatpush1.bf16.msra.mxu1 %v1613_v33 }
  0x40   :  { %451 = vmatprep.subr.bf16.mxu1 %v1618_v34 }
  0x42   :  { %443 = vmatmul.mubr.bf16.vlgmr.msra.gmra.mrb[0].mxu1 %v1913_v35 }
  0x43   :  { %452 = vmatpush1.bf16.msra.mxu1 %v1616_v36  ;;  %483 = vmatprep.mubr.bf16.mxu1 %v1391_v14 }
  0x44   :  { %453 = vmatprep.subr.bf16.mxu1 %v1621_v37 }
  0x47   :  { %454 = vmatpush1.bf16.msra.mxu1 %v1619_v38 }
  0x48   :  { %455 = vmatprep.subr.bf16.mxu1 %v1624_v39 }
  0x4b   :  { %456 = vmatpush1.bf16.msra.mxu1 %v1622_v40 }
  0x4c   :  { %457 = vmatprep.subr.bf16.mxu1 %v1627_v41 }
  0x4f   :  { %458 = vmatpush1.bf16.msra.mxu1 %v1625_v42 }
  0x50   :  { %459 = vmatprep.subr.bf16.mxu1 %v1630_v43 }
  0x53   :  { %460 = vmatpush1.bf16.msra.mxu1 %v1628_v44 }
  0x54   :  { %461 = vmatprep.subr.bf16.mxu1 %v1633_v45 }
  0x57   :  { %462 = vmatpush1.bf16.msra.mxu1 %v1631_v46 }
  0x58   :  { %463 = vmatprep.subr.bf16.mxu1 %v1636_v47 }
  0x5b   :  { %464 = vmatpush1.bf16.msra.mxu1 %v1634_v48 }
  0x5c   :  { %465 = vmatprep.subr.bf16.mxu1 %v1639_v49 }
  0x5f   :  { %466 = vmatpush1.bf16.msra.mxu1 %v1637_v50 }
  0x60   :  { %467 = vmatprep.subr.bf16.mxu1 %v1642_v51 }
  0x63   :  { %468 = vmatpush1.bf16.msra.mxu1 %v1640_v52 }
  0x64   :  { %469 = vmatprep.subr.bf16.mxu1 %v1645_v53 }
  0x67   :  { %470 = vmatpush1.bf16.msra.mxu1 %v1643_v54 }
  0x68   :  { %471 = vmatprep.subr.bf16.mxu1 %v1648_v55 }
  0x6b   :  { %472 = vmatpush1.bf16.msra.mxu1 %v1646_v56 }
  0x6c   :  { %473 = vmatprep.subr.bf16.mxu1 %v1651_v57 }
  0x6f   :  { %474 = vmatpush1.bf16.msra.mxu1 %v1649_v58 }
  0x70   :  { %475 = vmatprep.subr.bf16.mxu1 %v1654_v59 }
  0x73   :  { %476 = vmatpush1.bf16.msra.mxu1 %v1652_v60 }
  0x74   :  { %477 = vmatprep.subr.bf16.mxu1 %v1657_v61 }
  0x77   :  { %478 = vmatpush1.bf16.msra.mxu1 %v1655_v62 }
  0x78   :  { %479 = vmatprep.subr.bf16.mxu1 %v1660_v63 }
  0x7b   :  { %480 = vmatpush1.bf16.msra.mxu1 %v1658_v0  ;;  %v1664_v0 = vld [vmem:[%s2476_s2 + $0x4] ss:$8 sps:$4 sm:$0xff]  }
  0x7c   :  { %481 = vmatprep.subr.bf16.mxu1 %v1663_v1  ;;  %v1666_v1 = vld [vmem:[%s2476_s2] ss:$8 sps:$4 sm:$0xff]   ;;  %1064 = vmatprep.subr.bf16.mxu0 %v1664_v0 }
  0x7d   :  { %1065 = vmatpush1.bf16.msra.mxu0 %v1666_v1 }
  0x7f   :  { %482 = vmatpush1.bf16.msra.mxu1 %v1661_v2  ;;  %v1667_v2 = vld [vmem:[%s2476_s2 + $0x14] ss:$8 sps:$4 sm:$0xff]  }
  0x80   :  { %1066 = vmatprep.subr.bf16.mxu0 %v1667_v2 }
  0x82   :  { %484 = vmatmul.mubr.bf16.vlgmr.msra.gmra.mrb[4].mxu1 %v1913_v35 }
 0x115   :  { %v2010_v3 = vpop.f32.mrb[0].mxu1 }
 0x116   :  { %492 = vrot.lane.b32.xlu0 %v2010_v3, %s1782_s11  ;;  %v2013_v4 = vpop.f32.mrb[1].mxu1  ;;  %v570_v8 = vmul.f32 %v2010_v3, %v2010_v3 }
 0x117   :  { %v448_v5 = vpop.f32.mrb[2].mxu1  ;;  %v571_v6 = vmul.f32 %v2013_v4, %v2013_v4 }
 0x118   :  { %v449_v7 = vpop.f32.mrb[3].mxu1 }
 0x119   :  { %576 = vrot.lane.b32.xlu1 %v571_v6, %s1782_s11  ;;  %v1670_v7 = vld [vmem:[%s2476_s2 + $0x24] ss:$8 sps:$4 sm:$0xff]  }
 0x11a   :  { %494 = vrot.lane.b32.xlu0 %v2013_v4, %s1782_s11 }
 0x11e   :  { %574 = vrot.lane.b32.xlu0 %v570_v8, %s1782_s11 }
 0x155   :  { %v2020_v9 = vpop.f32.mrb[4].mxu1 }
 0x156   :  { %496 = vrot.lane.b32.xlu1 %v2020_v9, %s1782_s11  ;;  %v2023_v10 = vpop.f32.mrb[5].mxu1  ;;  %v572_v11 = vmul.f32 %v2020_v9, %v2020_v9 }
 0x157   :  { %v489_v12 = vpop.f32.mrb[6].mxu1  ;;  %v573_v14 = vmul.f32 %v2023_v10, %v2023_v10 }
 0x158   :  { %578 = vrot.lane.b32.xlu0 %v572_v11, %s1782_s11  ;;  %v490_v13 = vpop.f32.mrb[7].mxu1  ;;  %v1675_v12 = vld [vmem:[%s2476_s2 + $0x30] ss:$8 sps:$4 sm:$0xff]  }
 0x159   :  { %v1676_v13 = vld [vmem:[%s2476_s2 + $0x44] ss:$8 sps:$4 sm:$0xff]  }
 0x15a   :  { %498 = vrot.lane.b32.xlu1 %v2023_v10, %s1782_s11 }
 0x15e   :  { %580 = vrot.lane.b32.xlu1 %v573_v14, %s1782_s11 }
 0x188   :  { %v493_v17 = vpop.permute.xlu0 %492 }
 0x18b   :  { %v577_v21 = vpop.permute.xlu1 %576 }
 0x18c   :  { %v495_v18 = vpop.permute.xlu0 %494 }
 0x18d   :  { %v505_v19 = vsel %vm502_vm0, %v493_v17, %v495_v18 }
 0x18e   :  { %v508_v20 = vadd.f32 %v505_v19, %v2013_v4  ;;  %v1682_v19 = vld [vmem:[%s2476_s2 + $0x64] ss:$8 sps:$4 sm:$0xff]  }
 0x190   :  { %v575_v22 = vpop.permute.xlu0 %574  ;;  %513 = vrot.lane.b32.xlu1 %v508_v20, %s1783_s1 }
 0x191   :  { %v584_v23 = vsel %vm502_vm0, %v575_v22, %v577_v21 }
 0x192   :  { %v587_v24 = vadd.f32 %v584_v23, %v571_v6  ;;  %v1669_v6 = vld [vmem:[%s2476_s2 + $0x10] ss:$8 sps:$4 sm:$0xff]  }
 0x193   :  { %1067 = vmatpush1.bf16.msra.mxu0 %v1669_v6 }
 0x194   :  { %592 = vrot.lane.b32.xlu1 %v587_v24, %s1783_s1  ;;  %1068 = vmatprep.subr.bf16.mxu0 %v1670_v7 }
 0x1c8   :  { %v497_v25 = vpop.permute.xlu1 %496 }
 0x1c9   :  { %v504_v26 = vsel %vm502_vm0, %v495_v18, %v497_v25 }
 0x1ca   :  { %v509_v27 = vadd.f32 %v504_v26, %v2020_v9  ;;  %v579_v33 = vpop.permute.xlu0 %578  ;;  %v1687_v26 = vld [vmem:[%s2476_s2 + $0x70] ss:$8 sps:$4 sm:$0xff]  }
 0x1cb   :  { %v583_v39 = vsel %vm502_vm0, %v577_v21, %v579_v33 }
 0x1cc   :  { %515 = vrot.lane.b32.xlu0 %v509_v27, %s1783_s1  ;;  %v499_v28 = vpop.permute.xlu1 %498  ;;  %v588_v40 = vadd.f32 %v583_v39, %v572_v11  ;;  %v1673_v11 = vld [vmem:[%s2476_s2 + $0x34] ss:$8 sps:$4 sm:$0xff]  }
 0x1cd   :  { %v503_v29 = vsel %vm502_vm0, %v497_v25, %v499_v28  ;;  %v506_v30 = vsel %vm502_vm0, %v499_v28, %v493_v17  ;;  %v1681_v17 = vld [vmem:[%s2476_s2 + $0x50] ss:$8 sps:$4 sm:$0xff]   ;;  %v1685_v25 = vld [vmem:[%s2476_s2 + $0x74] ss:$8 sps:$4 sm:$0xff]  }
 0x1ce   :  { %v507_v31 = vadd.f32 %v506_v30, %v2010_v3  ;;  %v510_v32 = vadd.f32 %v503_v29, %v2023_v10 }
 0x1d0   :  { %511 = vrot.lane.b32.xlu0 %v507_v31, %s1783_s1  ;;  %517 = vrot.lane.b32.xlu1 %v510_v32, %s1783_s1  ;;  %v581_v34 = vpop.permute.xlu1 %580 }
 0x1d1   :  { %v582_v35 = vsel %vm502_vm0, %v579_v33, %v581_v34  ;;  %v585_v36 = vsel %vm502_vm0, %v581_v34, %v575_v22  ;;  %v1688_v34 = vld [vmem:[%s2476_s2 + $0x84] ss:$8 sps:$4 sm:$0xff]  }
 0x1d2   :  { %v586_v37 = vadd.f32 %v585_v36, %v570_v8  ;;  %v589_v38 = vadd.f32 %v582_v35, %v573_v14  ;;  %v1672_v8 = vld [vmem:[%s2476_s2 + $0x20] ss:$8 sps:$4 sm:$0xff]  }
 0x1d3   :  { %1069 = vmatpush1.bf16.msra.mxu0 %v1672_v8  ;;  %v1678_v14 = vld [vmem:[%s2476_s2 + $0x40] ss:$8 sps:$4 sm:$0xff]  }
 0x1d4   :  { %590 = vrot.lane.b32.xlu0 %v586_v37, %s1783_s1  ;;  %596 = vrot.lane.b32.xlu1 %v589_v38, %s1783_s1  ;;  %v1690_v36 = vld [vmem:[%s2476_s2 + $0x80] ss:$8 sps:$4 sm:$0xff]  }
 0x1d5   :  { %1070 = vmatprep.subr.bf16.mxu0 %v1673_v11 }
 0x1d7   :  { %1071 = vmatpush1.bf16.msra.mxu0 %v1675_v12 }
 0x1d8   :  { %594 = vrot.lane.b32.xlu0 %v588_v40, %s1783_s1  ;;  %1072 = vmatprep.subr.bf16.mxu0 %v1676_v13 }
 0x1db   :  { %1073 = vmatpush1.bf16.msra.mxu0 %v1678_v14 }
 0x1dc   :  { %1074 = vmatprep.subr.bf16.mxu0 %v1679_v15 }
 0x1df   :  { %1075 = vmatpush1.bf16.msra.mxu0 %v1681_v17 }
 0x1e0   :  { %1076 = vmatprep.subr.bf16.mxu0 %v1682_v19 }
 0x202   :  { %v514_v41 = vpop.permute.xlu1 %513 }
 0x206   :  { %v593_v42 = vpop.permute.xlu1 %592 }
 0x23e   :  { %v516_v43 = vpop.permute.xlu0 %515 }
 0x23f   :  { %v521_v44 = vsel %vm519_vm1, %v514_v41, %v516_v43 }
 0x240   :  { %v2064_v45 = vadd.f32 %v521_v44, %v509_v27 }
 0x242   :  { %v512_v46 = vpop.permute.xlu0 %511  ;;  %532 = vrot.lane.b32.xlu0 %v2064_v45, %s1784_s12  ;;  %v518_v47 = vpop.permute.xlu1 %517 }
 0x243   :  { %v522_v48 = vsel %vm519_vm1, %v512_v46, %v514_v41  ;;  %v523_v49 = vsel %vm519_vm1, %v518_v47, %v512_v46  ;;  %v520_v52 = vsel %vm519_vm1, %v516_v43, %v518_v47  ;;  %v1693_v43 = vld [vmem:[%s2476_s2 + $0x90] ss:$8 sps:$4 sm:$0xff]  }
 0x244   :  { %v525_v50 = vadd.f32 %v522_v48, %v508_v20  ;;  %v2072_v51 = vadd.f32 %v523_v49, %v507_v31  ;;  %v527_v56 = vadd.f32 %v520_v52, %v510_v32  ;;  %v1684_v20 = vld [vmem:[%s2476_s2 + $0x60] ss:$8 sps:$4 sm:$0xff]   ;;  %v1694_v49 = vld [vmem:[%s2476_s2 + $0xa4] ss:$8 sps:$4 sm:$0xff]   ;;  %v1697_v52 = vld [vmem:[%s2476_s2 + $0xb4] ss:$8 sps:$4 sm:$0xff]  }
 0x245   :  { %1077 = vmatpush1.bf16.msra.mxu0 %v1684_v20 }
 0x246   :  { %v591_v53 = vpop.permute.xlu0 %590  ;;  %530 = vrot.lane.b32.xlu1 %v525_v50, %s1784_s12  ;;  %528 = vrot.lane.b32.xlu0 %v2072_v51, %s1784_s12  ;;  %v597_v54 = vpop.permute.xlu1 %596 }
 0x247   :  { %v601_v55 = vsel %vm519_vm1, %v597_v54, %v591_v53  ;;  %v600_v58 = vsel %vm519_vm1, %v591_v53, %v593_v42  ;;  %1078 = vmatprep.subr.bf16.mxu0 %v1685_v25  ;;  %v1699_v53 = vld [vmem:[%s2476_s2 + $0xb0] ss:$8 sps:$4 sm:$0xff]  }
 0x248   :  { %v2081_v57 = vadd.f32 %v601_v55, %v586_v37  ;;  %v2090_v61 = vadd.f32 %v600_v58, %v587_v24  ;;  %v1702_v55 = vld [vmem:[%s2476_s2 + $0xc0] ss:$8 sps:$4 sm:$0xff]   ;;  %v1706_v58 = vld [vmem:[%s2476_s2 + $0xe4] ss:$8 sps:$4 sm:$0xff]  }
 0x249   :  { %1079 = vmatpush1.bf16.msra.mxu0 %v1687_v26 }
 0x24a   :  { %v595_v59 = vpop.permute.xlu0 %594  ;;  %534 = vrot.lane.b32.xlu1 %v527_v56, %s1784_s12  ;;  %606 = vrot.lane.b32.xlu0 %v2081_v57, %s1784_s12 }
 0x24b   :  { %v599_v60 = vsel %vm519_vm1, %v593_v42, %v595_v59  ;;  %v598_v63 = vsel %vm519_vm1, %v595_v59, %v597_v54  ;;  %1080 = vmatprep.subr.bf16.mxu0 %v1688_v34  ;;  %v1700_v54 = vld [vmem:[%s2476_s2 + $0xc4] ss:$8 sps:$4 sm:$0xff]   ;;  %v1708_v59 = vld [vmem:[%s2476_s2 + $0xe0] ss:$8 sps:$4 sm:$0xff]  }
 0x24c   :  { %v2092_v62 = vadd.f32 %v599_v60, %v588_v40  ;;  %v2109_v5 = vadd.f32 %v598_v63, %v589_v38  ;;  %v1691_v40 = vld [vmem:[%s2476_s2 + $0x94] ss:$8 sps:$4 sm:$0xff]  }
 0x24d   :  { %1081 = vmatpush1.bf16.msra.mxu0 %v1690_v36  ;;  %v1709_v60 = vld [vmem:[%s2476_s2 + $0xf4] ss:$8 sps:$4 sm:$0xff]  }
 0x24e   :  { %608 = vrot.lane.b32.xlu1 %v2090_v61, %s1784_s12  ;;  %610 = vrot.lane.b32.xlu0 %v2092_v62, %s1784_s12 }
 0x24f   :  { %1082 = vmatprep.subr.bf16.mxu0 %v1691_v40 }
 0x251   :  { %1083 = vmatpush1.bf16.msra.mxu0 %v1693_v43 }
 0x252   :  { %612 = vrot.lane.b32.xlu1 %v2109_v5, %s1784_s12  ;;  %1084 = vmatprep.subr.bf16.mxu0 %v1694_v49 }
 0x2b4   :  { %v533_v18 = vpop.permute.xlu0 %532 }
 0x2b8   :  { %v529_v21 = vpop.permute.xlu0 %528  ;;  %v531_v22 = vpop.permute.xlu1 %530 }
 0x2b9   :  { %v539_v23 = vsel %vm536_vm2, %v529_v21, %v531_v22  ;;  %v538_v33 = vsel %vm536_vm2, %v531_v22, %v533_v18 }
 0x2ba   :  { %v2149_v24 = vadd.f32 %v539_v23, %v525_v50  ;;  %v543_v38 = vadd.f32 %v538_v33, %v2064_v45  ;;  %v1696_v50 = vld [vmem:[%s2476_s2 + $0xa0] ss:$8 sps:$4 sm:$0xff]  }
 0x2bb   :  { %1085 = vmatpush1.bf16.msra.mxu0 %v1696_v50 }
 0x2bc   :  { %547 = vrot.lane.b32.xlu1 %v2149_v24, %s1785_s19  ;;  %v535_v27 = vpop.permute.xlu1 %534  ;;  %v607_v30 = vpop.permute.xlu0 %606  ;;  %1086 = vmatprep.subr.bf16.mxu0 %v1697_v52 }
 0x2bd   :  { %v537_v28 = vsel %vm536_vm2, %v533_v18, %v535_v27  ;;  %v540_v29 = vsel %vm536_vm2, %v535_v27, %v529_v21 }
 0x2be   :  { %v2164_v31 = vadd.f32 %v540_v29, %v2072_v51  ;;  %v2166_v32 = vadd.f32 %v537_v28, %v527_v56  ;;  %v1703_v56 = vld [vmem:[%s2476_s2 + $0xd4] ss:$8 sps:$4 sm:$0xff]  }
 0x2bf   :  { %1087 = vmatpush1.bf16.msra.mxu0 %v1699_v53 }
 0x2c0   :  { %545 = vrot.lane.b32.xlu0 %v2164_v31, %s1785_s19  ;;  %551 = vrot.lane.b32.xlu1 %v2166_v32, %s1785_s19  ;;  %v609_v35 = vpop.permute.xlu1 %608  ;;  %v611_v41 = vpop.permute.xlu0 %610 }
 0x2c1   :  { %v616_v37 = vsel %vm536_vm2, %v607_v30, %v609_v35  ;;  %v615_v48 = vsel %vm536_vm2, %v609_v35, %v611_v41  ;;  %1088 = vmatprep.subr.bf16.mxu0 %v1700_v54 }
 0x2c2   :  { %v2184_v39 = vadd.f32 %v616_v37, %v2090_v61  ;;  %v620_v51 = vadd.f32 %v615_v48, %v2092_v62  ;;  %v1711_v61 = vld [vmem:[%s2476_s2 + $0xf0] ss:$8 sps:$4 sm:$0xff]   ;;  %v1714_v62 = vld [vmem:[%s2476_s2 + $0x104] ss:$8 sps:$4 sm:$0xff]  }
 0x2c3   :  { %1089 = vmatpush1.bf16.msra.mxu0 %v1702_v55 }
 0x2c4   :  { %549 = vrot.lane.b32.xlu0 %v543_v38, %s1785_s19  ;;  %624 = vrot.lane.b32.xlu1 %v2184_v39, %s1785_s19  ;;  %v613_v42 = vpop.permute.xlu1 %612 }
 0x2c5   :  { %v614_v44 = vsel %vm536_vm2, %v611_v41, %v613_v42  ;;  %v617_v45 = vsel %vm536_vm2, %v613_v42, %v607_v30  ;;  %1090 = vmatprep.subr.bf16.mxu0 %v1703_v56 }
 0x2c6   :  { %v618_v46 = vadd.f32 %v617_v45, %v2081_v57  ;;  %v2201_v47 = vadd.f32 %v614_v44, %v2109_v5  ;;  %v1705_v57 = vld [vmem:[%s2476_s2 + $0xd0] ss:$8 sps:$4 sm:$0xff]  }
 0x2c7   :  { %1091 = vmatpush1.bf16.msra.mxu0 %v1705_v57 }
 0x2c8   :  { %622 = vrot.lane.b32.xlu0 %v618_v46, %s1785_s19  ;;  %628 = vrot.lane.b32.xlu1 %v2201_v47, %s1785_s19 }
 0x2c9   :  { %1092 = vmatprep.subr.bf16.mxu0 %v1706_v58 }
 0x2cb   :  { %1093 = vmatpush1.bf16.msra.mxu0 %v1708_v59 }
 0x2cc   :  { %626 = vrot.lane.b32.xlu0 %v620_v51, %s1785_s19  ;;  %1094 = vmatprep.subr.bf16.mxu0 %v1709_v60 }
 0x2cf   :  { %1095 = vmatpush1.bf16.msra.mxu0 %v1711_v61 }
 0x2d0   :  { %1105 = vmatprep.subr.bf16.mxu0 %v1714_v62 }
 0x32e   :  { %v548_v63 = vpop.permute.xlu1 %547 }
 0x332   :  { %v546_v0 = vpop.permute.xlu0 %545  ;;  %v552_v1 = vpop.permute.xlu1 %551 }
 0x333   :  { %v556_v2 = vsel %vm553_vm3, %v546_v0, %v548_v63  ;;  %v557_v5 = vsel %vm553_vm3, %v552_v1, %v546_v0 }
 0x334   :  { %v559_v8 = vadd.f32 %v556_v2, %v2149_v24  ;;  %v558_v11 = vadd.f32 %v557_v5, %v2164_v31 }
 0x336   :  { %v550_v6 = vpop.permute.xlu0 %549  ;;  %v625_v7 = vpop.permute.xlu1 %624  ;;  %v563_v22 = vadd.f32 %v559_v8, %v558_v11 }
 0x337   :  { %v554_v12 = vsel %vm553_vm3, %v550_v6, %v552_v1  ;;  %v555_v13 = vsel %vm553_vm3, %v548_v63, %v550_v6 }
 0x338   :  { %v560_v14 = vadd.f32 %v555_v13, %v543_v38  ;;  %v561_v15 = vadd.f32 %v554_v12, %v2166_v32  ;;  %v1723_v12 = vld [vmem:[%s2476_s2 + $0x134] ss:$8 sps:$4 sm:$0xff]   ;;  %v1721_v13 = vld [vmem:[%s2476_s2 + $0x130] ss:$8 sps:$4 sm:$0xff]  }
 0x33a   :  { %v562_v17 = vadd.f32 %v561_v15, %v558_v11  ;;  %v564_v18 = vadd.f32 %v560_v14, %v559_v8  ;;  %v565_v19 = vadd.f32 %v561_v15, %v560_v14  ;;  %v623_v20 = vpop.permute.xlu0 %622  ;;  %v629_v21 = vpop.permute.xlu1 %628  ;;  %v1720_v8 = vld [vmem:[%s2476_s2 + $0x124] ss:$8 sps:$4 sm:$0xff]   ;;  %v1718_v11 = vld [vmem:[%s2476_s2 + $0x120] ss:$8 sps:$4 sm:$0xff]  }
 0x33b   :  { %v632_v23 = vsel %vm553_vm3, %v623_v20, %v625_v7  ;;  %v633_v24 = vsel %vm553_vm3, %v629_v21, %v623_v20  ;;  %v1726_v14 = vld [vmem:[%s2476_s2 + $0x144] ss:$8 sps:$4 sm:$0xff]   ;;  %v1724_v15 = vld [vmem:[%s2476_s2 + $0x140] ss:$8 sps:$4 sm:$0xff]  }
 0x33c   :  { %v566_v25 = vadd.f32 %v564_v18, %v562_v17  ;;  %v567_v26 = vadd.f32 %v565_v19, %v563_v22  ;;  %v635_v28 = vadd.f32 %v632_v23, %v2184_v39  ;;  %v634_v29 = vadd.f32 %v633_v24, %v618_v46  ;;  %v1729_v17 = vld [vmem:[%s2476_s2 + $0x154] ss:$8 sps:$4 sm:$0xff]   ;;  %v1727_v18 = vld [vmem:[%s2476_s2 + $0x150] ss:$8 sps:$4 sm:$0xff]   ;;  %v1732_v19 = vld [vmem:[%s2476_s2 + $0x164] ss:$8 sps:$4 sm:$0xff]  }
 0x33d   :  { %v1730_v20 = vld [vmem:[%s2476_s2 + $0x160] ss:$8 sps:$4 sm:$0xff]   ;;  %v1733_v22 = vld [vmem:[%s2476_s2 + $0x170] ss:$8 sps:$4 sm:$0xff]   ;;  %v1738_v23 = vld [vmem:[%s2476_s2 + $0x184] ss:$8 sps:$4 sm:$0xff]  }
 0x33e   :  { %v568_v27 = vmul.f32 0.015625, %v566_v25  ;;  %v627_v30 = vpop.permute.xlu0 %626  ;;  %v569_v36 = vmul.f32 0.015625, %v567_v26  ;;  %v639_v37 = vadd.f32 %v635_v28, %v634_v29  ;;  %v1736_v24 = vld [vmem:[%s2476_s2 + $0x180] ss:$8 sps:$4 sm:$0xff]   ;;  %v1741_v25 = vld [vmem:[%s2476_s2 + $0x194] ss:$8 sps:$4 sm:$0xff]  }
 0x33f   :  { %v630_v31 = vsel %vm553_vm3, %v627_v30, %v629_v21  ;;  %v631_v32 = vsel %vm553_vm3, %v625_v7, %v627_v30  ;;  %v1715_v7 = vld [vmem:[%s2476_s2 + $0x110] ss:$8 sps:$4 sm:$0xff]   ;;  %v1735_v21 = vld [vmem:[%s2476_s2 + $0x174] ss:$8 sps:$4 sm:$0xff]  }
 0x340   :  { %v654_v33 = vsub.f32 %v2020_v9, %v568_v27  ;;  %v636_v34 = vadd.f32 %v631_v32, %v620_v51  ;;  %v637_v35 = vadd.f32 %v630_v31, %v2201_v47  ;;  %v646_v45 = vmul.f32 %v568_v27, %v568_v27  ;;  %v1739_v26 = vld [vmem:[%s2476_s2 + $0x190] ss:$8 sps:$4 sm:$0xff]   ;;  %v1750_v31 = vld [vmem:[%s2476_s2 + $0x1c4] ss:$8 sps:$4 sm:$0xff]   ;;  %v1748_v32 = vld [vmem:[%s2476_s2 + $0x1c0] ss:$8 sps:$4 sm:$0xff]  }
 0x341   :  { %v647_v46 = vmul.f32 %v569_v36, %v569_v36  ;;  %v652_v47 = vsub.f32 %v2010_v3, %v568_v27  ;;  %v653_v54 = vsub.f32 %v2013_v4, %v569_v36  ;;  %v655_v55 = vsub.f32 %v2023_v10, %v569_v36  ;;  %v1712_v4 = vld [vmem:[%s2476_s2 + $0x100] ss:$8 sps:$4 sm:$0xff]   ;;  %v1717_v10 = vld [vmem:[%s2476_s2 + $0x114] ss:$8 sps:$4 sm:$0xff]   ;;  %v1744_v27 = vld [vmem:[%s2476_s2 + $0x1a4] ss:$8 sps:$4 sm:$0xff]  }
 0x342   :  { %v638_v38 = vadd.f32 %v637_v35, %v634_v29  ;;  %v640_v40 = vadd.f32 %v636_v34, %v635_v28  ;;  %v641_v41 = vadd.f32 %v637_v35, %v636_v34  ;;  %v1742_v28 = vld [vmem:[%s2476_s2 + $0x1a0] ss:$8 sps:$4 sm:$0xff]   ;;  %v1747_v29 = vld [vmem:[%s2476_s2 + $0x1b4] ss:$8 sps:$4 sm:$0xff]   ;;  %v1745_v30 = vld [vmem:[%s2476_s2 + $0x1b0] ss:$8 sps:$4 sm:$0xff]  }
 0x343   :  { %v1751_v34 = vld [vmem:[%s2476_s2 + $0x1d0] ss:$8 sps:$4 sm:$0xff]   ;;  %v1756_v35 = vld [vmem:[%s2476_s2 + $0x1e4] ss:$8 sps:$4 sm:$0xff]   ;;  %v1754_v36 = vld [vmem:[%s2476_s2 + $0x1e0] ss:$8 sps:$4 sm:$0xff]  }
 0x344   :  { %v642_v42 = vadd.f32 %v640_v40, %v638_v38  ;;  %v643_v39 = vadd.f32 %v641_v41, %v639_v37  ;;  %v1759_v37 = vld [vmem:[%s2476_s2 + $0x1f4] ss:$8 sps:$4 sm:$0xff]   ;;  %v1757_v40 = vld [vmem:[%s2476_s2 + $0x1f0] ss:$8 sps:$4 sm:$0xff]  }
 0x346   :  { %v644_v43 = vmul.f32 0.015625, %v642_v42  ;;  %v645_v44 = vmul.f32 0.015625, %v643_v39 }
 0x348   :  { %v648_v48 = vsub.f32 %v644_v43, %v646_v45  ;;  %v649_v49 = vsub.f32 %v645_v44, %v647_v46 }
 0x34a   :  { %v650_v50 = vmax.f32 %v648_v48, 0.0  ;;  %v651_v52 = vmax.f32 %v649_v49, 0.0 }
 0x34c   :  { %v656_v53 = vadd.f32 1e-05, %v650_v50  ;;  %v657_v9 = vadd.f32 1e-05, %v651_v52 }
 0x34e   :  { %1776 = vrsqrt.f32 %v656_v53 }
 0x34f   :  { %1778 = vrsqrt.f32 %v657_v9 }
 0x358   :  { %v1777_v51 = vpop.eup %1776 }
 0x359   :  { %v1779_v56 = vpop.eup %1778  ;;  %v660_v57 = vmul.f32 %v1777_v51, %v652_v47  ;;  %v2275_v58 = vmul.f32 %v1777_v51, %v654_v33  ;;  %v1753_v33 = vld [vmem:[%s2476_s2 + $0x1d4] ss:$8 sps:$4 sm:$0xff]  }
 0x35a   :  { %v661_v59 = vmul.f32 %v1779_v56, %v653_v54  ;;  %v663_v60 = vmul.f32 %v1779_v56, %v655_v55 }
 0x35b   :  { %vm664_vm4 = vcmp.ge.f32.partialorder %v660_v57, 0.0  ;;  %v668_v61 = vmul.f32 0.2, %v660_v57  ;;  %v670_v38 = vmul.f32 0.2, %v2275_v58  ;;  %vm666_vm7 = vcmp.ge.f32.partialorder %v2275_v58, 0.0 }
 0x35c   :  { %vm665_vm5 = vcmp.ge.f32.partialorder %v661_v59, 0.0  ;;  %v669_v62 = vmul.f32 0.2, %v661_v59  ;;  %vm667_vm6 = vcmp.ge.f32.partialorder %v663_v60, 0.0  ;;  %v671_v63 = vmul.f32 0.2, %v663_v60 }
 0x35d   :  { %v672_v0 = vsel %vm664_vm4, %v660_v57, %v668_v61  ;;  %v674_v41 = vsel %vm666_vm7, %v2275_v58, %v670_v38  ;;  %v1762_v61 = vld [vmem:[%s2477_s3 + $0x48] sm:$0xff]  }
 0x35e   :  { %v673_v1 = vsel %vm665_vm5, %v661_v59, %v669_v62  ;;  %v676_v3 = vpack.c.bf16 %v672_v0, %v672_v0  ;;  %v675_v2 = vsel %vm667_vm6, %v663_v60, %v671_v63  ;;  %v678_v42 = vpack.c.bf16 %v674_v41, %v674_v41  ;;  %v1760_v59 = vld [vmem:[%s2477_s3 + $0x40] sm:$0xff]   ;;  %v1763_v62 = vld [vmem:[%s2477_s3 + $0x8] sm:$0xff]  }
 0x35f   :  { %v677_v5 = vpack.c.bf16 %v673_v1, %v673_v1  ;;  %v679_v6 = vpack.c.bf16 %v675_v2, %v675_v2  ;;  %v1761_v60 = vld [vmem:[%s2477_s3] sm:$0xff]   ;;  %1536 = vmatprep.subr.bf16.mxu1 %v1760_v59  ;;  %v1764_v2 = vld [vmem:[%s2477_s3 + $0x50] sm:$0xff]  }
 0x360   :  { %1537 = vmatpush3.bf16.msra.mxu1 %v1761_v60 }
 0x361   :  { %1096 = vmatprep.mubr.bf16.mxu0 %v677_v5  ;;  %1538 = vmatprep.subr.bf16.mxu1 %v1762_v61 }
 0x362   :  { %1097 = vmatmul.mubr.bf16.vlgmr.msra.gmra.mrb[0].mxu0 %v676_v3 }
 0x363   :  { %1106 = vmatpush1.bf16.msra.mxu0 %v1712_v4  ;;  %1137 = vmatprep.mubr.bf16.mxu0 %v679_v6 }
 0x364   :  { %1107 = vmatprep.subr.bf16.mxu0 %v1717_v10  ;;  %1539 = vmatpush3.bf16.msra.mxu1 %v1763_v62  ;;  %v1765_v10 = vld [vmem:[%s2477_s3 + $0x10] sm:$0xff]  }
 0x365   :  { %1540 = vmatprep.subr.bf16.mxu1 %v1764_v2 }
 0x367   :  { %1108 = vmatpush1.bf16.msra.mxu0 %v1715_v7 }
 0x368   :  { %1109 = vmatprep.subr.bf16.mxu0 %v1720_v8  ;;  %1541 = vmatpush3.bf16.msra.mxu1 %v1765_v10 }
 0x36b   :  { %1110 = vmatpush1.bf16.msra.mxu0 %v1718_v11 }
 0x36c   :  { %1111 = vmatprep.subr.bf16.mxu0 %v1723_v12  ;;  %v1766_v12 = vld [vmem:[%s2477_s3 + $0x58] sm:$0xff]  }
 0x36d   :  { %1542 = vmatprep.subr.bf16.mxu1 %v1766_v12 }
 0x36f   :  { %1112 = vmatpush1.bf16.msra.mxu0 %v1721_v13 }
 0x370   :  { %1113 = vmatprep.subr.bf16.mxu0 %v1726_v14 }
 0x373   :  { %1114 = vmatpush1.bf16.msra.mxu0 %v1724_v15  ;;  %v1767_v15 = vld [vmem:[%s2477_s3 + $0x18] sm:$0xff]  }
 0x374   :  { %1115 = vmatprep.subr.bf16.mxu0 %v1729_v17  ;;  %v1768_v17 = vld [vmem:[%s2477_s3 + $0x60] sm:$0xff]   ;;  %1543 = vmatpush3.bf16.msra.mxu1 %v1767_v15 }
 0x375   :  { %1544 = vmatprep.subr.bf16.mxu1 %v1768_v17 }
 0x377   :  { %1116 = vmatpush1.bf16.msra.mxu0 %v1727_v18  ;;  %v1769_v18 = vld [vmem:[%s2477_s3 + $0x20] sm:$0xff]  }
 0x378   :  { %1117 = vmatprep.subr.bf16.mxu0 %v1732_v19  ;;  %v1770_v19 = vld [vmem:[%s2477_s3 + $0x68] sm:$0xff]   ;;  %1545 = vmatpush3.bf16.msra.mxu1 %v1769_v18 }
 0x379   :  { %1546 = vmatprep.subr.bf16.mxu1 %v1770_v19 }
 0x37b   :  { %1118 = vmatpush1.bf16.msra.mxu0 %v1730_v20  ;;  %v1771_v20 = vld [vmem:[%s2477_s3 + $0x28] sm:$0xff]  }
 0x37c   :  { %1119 = vmatprep.subr.bf16.mxu0 %v1735_v21  ;;  %v1772_v21 = vld [vmem:[%s2477_s3 + $0x70] sm:$0xff]   ;;  %1547 = vmatpush3.bf16.msra.mxu1 %v1771_v20 }
 0x37d   :  { %1548 = vmatprep.subr.bf16.mxu1 %v1772_v21 }
 0x37f   :  { %1120 = vmatpush1.bf16.msra.mxu0 %v1733_v22  ;;  %v1773_v22 = vld [vmem:[%s2477_s3 + $0x30] sm:$0xff]  }
 0x380   :  { %1121 = vmatprep.subr.bf16.mxu0 %v1738_v23  ;;  %v1774_v23 = vld [vmem:[%s2477_s3 + $0x78] sm:$0xff]   ;;  %1549 = vmatpush3.bf16.msra.mxu1 %v1773_v22 }
 0x381   :  { %1550 = vmatprep.subr.bf16.mxu1 %v1774_v23 }
 0x383   :  { %1122 = vmatpush1.bf16.msra.mxu0 %v1736_v24  ;;  %v1775_v24 = vld [vmem:[%s2477_s3 + $0x38] sm:$0xff]  }
 0x384   :  { %1123 = vmatprep.subr.bf16.mxu0 %v1741_v25  ;;  %1551 = vmatpush3.bf16.msra.mxu1 %v1775_v24 }
 0x387   :  { %1124 = vmatpush1.bf16.msra.mxu0 %v1739_v26 }
 0x388   :  { %1125 = vmatprep.subr.bf16.mxu0 %v1744_v27 }
 0x38b   :  { %1126 = vmatpush1.bf16.msra.mxu0 %v1742_v28 }
 0x38c   :  { %1127 = vmatprep.subr.bf16.mxu0 %v1747_v29 }
 0x38f   :  { %1128 = vmatpush1.bf16.msra.mxu0 %v1745_v30 }
 0x390   :  { %1129 = vmatprep.subr.bf16.mxu0 %v1750_v31 }
 0x393   :  { %1130 = vmatpush1.bf16.msra.mxu0 %v1748_v32 }
 0x394   :  { %1131 = vmatprep.subr.bf16.mxu0 %v1753_v33 }
 0x397   :  { %1132 = vmatpush1.bf16.msra.mxu0 %v1751_v34 }
 0x398   :  { %1133 = vmatprep.subr.bf16.mxu0 %v1756_v35 }
 0x39b   :  { %1134 = vmatpush1.bf16.msra.mxu0 %v1754_v36 }
 0x39c   :  { %1135 = vmatprep.subr.bf16.mxu0 %v1759_v37 }
 0x39f   :  { %1136 = vmatpush1.bf16.msra.mxu0 %v1757_v40 }
 0x3a2   :  { %1138 = vmatmul.mubr.bf16.vlgmr.msra.gmra.mrb[0].mxu0 %v678_v42 }
 0x475   :  { %v2373_v39 = vpop.f32.mrb[0].mxu0 }
 0x476   :  { %1146 = vrot.lane.b32.xlu0 %v2373_v39, %s1783_s1  ;;  %v2377_v43 = vpop.f32.mrb[1].mxu0  ;;  %v1172_v46 = vmul.f32 %v2373_v39, %v2373_v39 }
 0x477   :  { %1148 = vrot.lane.b32.xlu1 %v2377_v43, %s1783_s1  ;;  %v1143_v44 = vpop.f32.mrb[2].mxu0  ;;  %v1173_v48 = vmul.f32 %v2377_v43, %v2377_v43 }
 0x478   :  { %v1144_v45 = vpop.f32.mrb[3].mxu0 }
 0x47a   :  { %1174 = vrot.lane.b32.xlu0 %v1172_v46, %s1783_s1 }
 0x47b   :  { %1176 = vrot.lane.b32.xlu1 %v1173_v48, %s1783_s1 }
 0x4e8   :  { %v1147_v49 = vpop.permute.xlu0 %1146 }
 0x4e9   :  { %v1149_v50 = vpop.permute.xlu1 %1148 }
 0x4ea   :  { %v1150_v52 = vsel %vm519_vm1, %v1147_v49, %v1149_v50  ;;  %v1151_v53 = vsel %vm519_vm1, %v1149_v50, %v1147_v49 }
 0x4eb   :  { %v1152_v9 = vadd.f32 %v1151_v53, %v2373_v39  ;;  %v1153_v47 = vadd.f32 %v1150_v52, %v2377_v43 }
 0x4ec   :  { %v1175_v51 = vpop.permute.xlu0 %1174 }
 0x4ed   :  { %1154 = vrot.lane.b32.xlu0 %v1152_v9, %s1784_s12  ;;  %1156 = vrot.lane.b32.xlu1 %v1153_v47, %s1784_s12  ;;  %v1177_v54 = vpop.permute.xlu1 %1176 }
 0x4ee   :  { %v1178_v55 = vsel %vm519_vm1, %v1175_v51, %v1177_v54  ;;  %v1179_v56 = vsel %vm519_vm1, %v1177_v54, %v1175_v51 }
 0x4ef   :  { %v1180_v57 = vadd.f32 %v1179_v56, %v1172_v46  ;;  %v1181_v58 = vadd.f32 %v1178_v55, %v1173_v48 }
 0x4f1   :  { %1182 = vrot.lane.b32.xlu0 %v1180_v57, %s1784_s12  ;;  %1184 = vrot.lane.b32.xlu1 %v1181_v58, %s1784_s12 }
 0x55f   :  { %v1155_v63 = vpop.permute.xlu0 %1154  ;;  %v1157_v0 = vpop.permute.xlu1 %1156 }
 0x560   :  { %v1158_v1 = vsel %vm536_vm2, %v1155_v63, %v1157_v0  ;;  %v1159_v3 = vsel %vm536_vm2, %v1157_v0, %v1155_v63 }
 0x561   :  { %v1160_v5 = vadd.f32 %v1159_v3, %v1152_v9  ;;  %v1161_v4 = vadd.f32 %v1158_v1, %v1153_v47 }
 0x563   :  { %v1183_v6 = vpop.permute.xlu0 %1182  ;;  %1162 = vrot.lane.b32.xlu0 %v1160_v5, %s1785_s19  ;;  %1164 = vrot.lane.b32.xlu1 %v1161_v4, %s1785_s19  ;;  %v1185_v7 = vpop.permute.xlu1 %1184 }
 0x564   :  { %v1186_v8 = vsel %vm536_vm2, %v1183_v6, %v1185_v7  ;;  %v1187_v11 = vsel %vm536_vm2, %v1185_v7, %v1183_v6 }
 0x565   :  { %v1188_v13 = vadd.f32 %v1187_v11, %v1180_v57  ;;  %v1189_v14 = vadd.f32 %v1186_v8, %v1181_v58 }
 0x567   :  { %1190 = vrot.lane.b32.xlu0 %v1188_v13, %s1785_s19  ;;  %1192 = vrot.lane.b32.xlu1 %v1189_v14, %s1785_s19 }
 0x5d5   :  { %v1163_v25 = vpop.permute.xlu0 %1162  ;;  %v1165_v26 = vpop.permute.xlu1 %1164 }
 0x5d6   :  { %v1166_v27 = vsel %vm553_vm3, %v1163_v25, %v1165_v26  ;;  %v1167_v28 = vsel %vm553_vm3, %v1165_v26, %v1163_v25 }
 0x5d7   :  { %v1168_v29 = vadd.f32 %v1167_v28, %v1160_v5  ;;  %v1169_v30 = vadd.f32 %v1166_v27, %v1161_v4 }
 0x5d9   :  { %v1170_v31 = vadd.f32 %v1169_v30, %v1168_v29  ;;  %v1191_v32 = vpop.permute.xlu0 %1190  ;;  %v1193_v33 = vpop.permute.xlu1 %1192 }
 0x5da   :  { %v1194_v34 = vsel %vm553_vm3, %v1191_v32, %v1193_v33  ;;  %v1195_v35 = vsel %vm553_vm3, %v1193_v33, %v1191_v32 }
 0x5db   :  { %v1171_v36 = vmul.f32 0.0625, %v1170_v31  ;;  %v1196_v37 = vadd.f32 %v1195_v35, %v1188_v13  ;;  %v1197_v38 = vadd.f32 %v1194_v34, %v1189_v14 }
 0x5dd   :  { %v1198_v40 = vadd.f32 %v1197_v38, %v1196_v37  ;;  %v1200_v41 = vmul.f32 %v1171_v36, %v1171_v36  ;;  %v1203_v48 = vsub.f32 %v2373_v39, %v1171_v36  ;;  %v1204_v49 = vsub.f32 %v2377_v43, %v1171_v36 }
 0x5df   :  { %v1199_v42 = vmul.f32 0.0625, %v1198_v40 }
 0x5e1   :  { %v1201_v44 = vsub.f32 %v1199_v42, %v1200_v41 }
 0x5e3   :  { %v1202_v45 = vmax.f32 %v1201_v44, 0.0 }
 0x5e5   :  { %v1205_v46 = vadd.f32 1e-05, %v1202_v45 }
 0x5e7   :  { %1780 = vrsqrt.f32 %v1205_v46 }
 0x5f1   :  { %v1781_v50 = vpop.eup %1780 }
 0x5f2   :  { %v1208_v52 = vmul.f32 %v1781_v50, %v1204_v49  ;;  %v1207_v53 = vmul.f32 %v1781_v50, %v1203_v48 }
 0x5f4   :  { %vm1210_vm8 = vcmp.ge.f32.partialorder %v1208_v52, 0.0  ;;  %v1212_v16 = vmul.f32 0.2, %v1208_v52  ;;  %vm1209_vm9 = vcmp.ge.f32.partialorder %v1207_v53, 0.0  ;;  %v1211_v9 = vmul.f32 0.2, %v1207_v53 }
 0x5f6   :  { %v1214_v47 = vsel %vm1210_vm8, %v1208_v52, %v1212_v16  ;;  %v1213_v51 = vsel %vm1209_vm9, %v1207_v53, %v1211_v9 }
 0x5f7   :  { %v1216_v54 = vpack.c.bf16 %v1214_v47, %v1214_v47  ;;  %v1215_v55 = vpack.c.bf16 %v1213_v51, %v1213_v51 }
 0x5f9   :  { %1377 = vmatprep.mubr.bf16.mxu1 %v1216_v54 }
 0x5fa   :  { %1378 = vmatmul.mubr.bf16.vlgmr.msra.gmra.mrb[8].mxu1 %v1215_v55 }
 0x6cd   :  { %v1552_v56 = vpop.f32.mrb[8].mxu1 }
 0x6ce   :  { %v1553_v57 = vpop.f32.mrb[9].mxu1 }
 0x6cf   :  { %v1554_v58 = vadd.f32 %v1553_v57, %v1552_v56  ;;  %v1555_v59 = vpop.f32.mrb[10].mxu1 }
 0x6d0   :  { %v1556_v39 = vpop.f32.mrb[11].mxu1 }
 0x6d1   :  { %1385 = vst [vmem:[%s2478_s4] sm:$0xff] %v1554_v58 }

</bundles_post_ra>
